<compile_context>
chip_gen: v7x
topology: tpu7x:2x2x1
jax: 0.10.0
libtpu: 0.0.40
codegen_flags: <defaults>
</compile_context>

<pallas_src>
import jax
import jax.numpy as jnp
from jax.experimental import pallas as pl
from jax.experimental.pallas import tpu as pltpu


def _round_up(x: int, m: int) -> int:
    return (x + m - 1) // m * m


_TM_MAX = 512    # M-tile cap (rows of x)
_TN_MAX = 512    # N-tile cap (full WIRE hidden widths fit in one tile)
_TK_MAX = 1024   # use a single full-extent K block up to this size


# --------------------------------------------------------------------------
# Kernels
# --------------------------------------------------------------------------
def _gabor_relu_fullk_kernel(x_ref, w_ref, b_ref, o_ref):
    """One (tm, tn) output tile; whole contraction dim in one block.

    No accumulator scratch, no init/finalize phases.  omega_0*lin and
    scale_0*lin in the PyTorch forward are dead values and are not computed.
    """
    acc = jnp.dot(x_ref[...], w_ref[...], preferred_element_type=jnp.float32)
    o_ref[...] = jnp.maximum(acc + b_ref[...], 0.0).astype(o_ref.dtype)


def _gabor_relu_ktiled_kernel(x_ref, w_ref, b_ref, o_ref):
    """Fallback for large K.  Output block index (i, j) is invariant across
    the K grid axis, so o_ref (f32) stays VMEM-resident and we accumulate
    into it directly (no separate scratch)."""
    k = pl.program_id(2)

    @pl.when(k == 0)
    def _():
        o_ref[...] = jnp.zeros_like(o_ref)

    o_ref[...] += jnp.dot(x_ref[...], w_ref[...],
                          preferred_element_type=jnp.float32)

    @pl.when(k == pl.num_programs(2) - 1)
    def _():
        o_ref[...] = jnp.maximum(o_ref[...] + b_ref[...], 0.0)


# --------------------------------------------------------------------------
# Parameter preparation (run once; amortized across forward calls)
# --------------------------------------------------------------------------
def prepare_gabor_params(weight, bias=None, *, compute_dtype=jnp.float32):
    """Transpose to lane-dense (K, N), cast, and pad — hoisted off the
    per-call path since weights are static across forward calls."""
    out_features, in_features = weight.shape
    K, N = in_features, out_features

    tn = min(_round_up(N, 128), _TN_MAX)
    Np = _round_up(N, tn)
    Kp = K if K <= _TK_MAX else _round_up(K, 512)

    wt = jnp.transpose(weight).astype(compute_dtype)          # (K, N)
    if bias is None:
        b2 = jnp.zeros((1, N), jnp.float32)
    else:
        b2 = jnp.reshape(bias, (1, N)).astype(jnp.float32)

    if (Kp, Np) != (K, N):
        wt = jnp.pad(wt, ((0, Kp - K), (0, Np - N)))
    if Np != N:
        b2 = jnp.pad(b2, ((0, 0), (0, Np - N)))
    return wt, b2


# --------------------------------------------------------------------------
# Forward pass
# --------------------------------------------------------------------------
def complex_gabor_forward(x, wt, b2, n_out, *, compute_dtype=None,
                          out_dtype=None):
    """ReLU(x @ W.T + b) using pre-prepared (K, N) weight `wt` and (1, N) bias.

    x:  (..., in_features)
    wt: (Kp, Np)  padded, lane-dense weight from prepare_gabor_params
    b2: (1, Np)   padded bias (f32)
    """
    Kp, Np = wt.shape
    K = x.shape[-1]
    N = n_out
    if compute_dtype is None:
        compute_dtype = wt.dtype
    if out_dtype is None:
        out_dtype = (jnp.float32 if jnp.dtype(compute_dtype) == jnp.float32
                     else compute_dtype)

    lead = x.shape[:-1]
    x2 = jnp.reshape(x, (-1, K)).astype(compute_dtype)
    M = x2.shape[0]

    full_k = Kp <= _TK_MAX          # prepare guarantees Kp == K in this case
    tk = Kp if full_k else 512

    # N tiling: one full-N tile whenever possible (x streamed from HBM once).
    tn = min(_round_up(N, 128), _TN_MAX)

    # M tiling: (8,·)-aligned; ensure >= 2 M-tiles when M permits so the two
    # TensorCores on v7x both get work along the "parallel" axis.
    Mp8 = _round_up(M, 8)
    tm = min(_TM_MAX, Mp8)
    if Mp8 // tm < 2 and Mp8 > 8:
        tm = max(8, _round_up(-(-Mp8 // 2), 8))
    Mp = _round_up(M, tm)

    if (Mp, Kp) != (M, K):
        x2 = jnp.pad(x2, ((0, Mp - M), (0, Kp - K)))

    # Explicit VMEM budget: double-buffered tiles, capped at 48 MiB (safe for
    # v7x's 64 MiB physical VMEM; well under v5e/v6e's 128 MiB).
    itemsize = jnp.dtype(compute_dtype).itemsize
    vmem_bytes = 2 * ((tm * tk + tk * tn) * itemsize + (tm * tn + tn) * 4)
    vmem_limit = int(min(max(vmem_bytes + (2 << 20), 20 << 20), 48 << 20))

    if full_k:
        grid = (Mp // tm, Np // tn)
        out = pl.pallas_call(
            _gabor_relu_fullk_kernel,
            out_shape=jax.ShapeDtypeStruct((Mp, Np), out_dtype),
            grid_spec=pltpu.PrefetchScalarGridSpec(
                num_scalar_prefetch=0,
                grid=grid,
                in_specs=[
                    pl.BlockSpec((tm, Kp), lambda i, j: (i, 0)),   # x tile
                    pl.BlockSpec((Kp, tn), lambda i, j: (0, j)),   # W.T tile
                    pl.BlockSpec((1, tn), lambda i, j: (0, j)),    # bias tile
                ],
                out_specs=pl.BlockSpec((tm, tn), lambda i, j: (i, j)),
            ),
            compiler_params=pltpu.CompilerParams(
                dimension_semantics=("parallel", "parallel"),
                vmem_limit_bytes=vmem_limit),
        )(x2, wt, b2)
    else:
        grid = (Mp // tm, Np // tn, Kp // tk)
        out = pl.pallas_call(
            _gabor_relu_ktiled_kernel,
            out_shape=jax.ShapeDtypeStruct((Mp, Np), jnp.float32),
            grid_spec=pltpu.PrefetchScalarGridSpec(
                num_scalar_prefetch=0,
                grid=grid,
                in_specs=[
                    pl.BlockSpec((tm, tk), lambda i, j, k: (i, k)),
                    pl.BlockSpec((tk, tn), lambda i, j, k: (k, j)),
                    pl.BlockSpec((1, tn), lambda i, j, k: (0, j)),
                ],
                out_specs=pl.BlockSpec((tm, tn), lambda i, j, k: (i, j)),
            ),
            compiler_params=pltpu.CompilerParams(
                dimension_semantics=("parallel", "parallel", "arbitrary"),
                vmem_limit_bytes=vmem_limit),
        )(x2, wt, b2)
        if jnp.dtype(out_dtype) != jnp.float32:
            out = out.astype(out_dtype)

    out = out[:M, :N]
    return jnp.reshape(out, lead + (N,))


def complex_gabor_layer(x, weight, bias=None, *, compute_dtype=jnp.float32):
    """Convenience wrapper mirroring ComplexGaborLayer.forward (is_first=True).

    weight: (out_features, in_features)  -- PyTorch nn.Linear layout.
    Prefer prepare_gabor_params + complex_gabor_forward to amortize the
    weight transpose / pad / cast across calls.
    """
    wt, b2 = prepare_gabor_params(weight, bias, compute_dtype=compute_dtype)
    return complex_gabor_forward(x, wt, b2, weight.shape[0],
                                 compute_dtype=compute_dtype)


def _reference(x, weight, bias):
    """Pure-JAX reference mirroring the PyTorch forward (ReLU(Linear(x)))."""
    lin = jnp.einsum("...k,nk->...n", x.astype(jnp.float32),
                     weight.astype(jnp.float32))
    if bias is not None:
        lin = lin + bias.astype(jnp.float32)
    return jnp.maximum(lin, 0.0)


if __name__ == "__main__":
    # TODO(synk): the is_first=False (torch.cfloat weights) path is not
    # translated; only the real-valued (is_first=True) layer is implemented.
    in_features = 32
    out_features = 64
    batch, seq = 2, 16

    key = jax.random.PRNGKey(0)
    kx, kw, kb = jax.random.split(key, 3)
    x = jax.random.uniform(kx, (batch, seq, in_features),
                           dtype=jnp.float32, minval=-1.0, maxval=1.0)
    bound = 1.0 / (in_features ** 0.5)
    weight = jax.random.uniform(kw, (out_features, in_features),
                                dtype=jnp.float32, minval=-bound, maxval=bound)
    bias = jax.random.uniform(kb, (out_features,),
                              dtype=jnp.float32, minval=-bound, maxval=bound)

    ref = _reference(x, weight, bias)

    # Default f32 path (matches nn.Linear numerics exactly); weight prep is
    # hoisted out of the per-call path and the forward is jitted.
    wt, b2 = prepare_gabor_params(weight, bias)
    forward = jax.jit(lambda xx: complex_gabor_forward(xx, wt, b2, out_features))
    out = jax.block_until_ready(forward(x))
    assert out.shape == ref.shape, (out.shape, ref.shape)
    assert jnp.allclose(out, ref, atol=1e-5, rtol=1e-5), "f32 mismatch vs reference"

    # Optional bf16 operand/output path (MXU-native, halves HBM traffic);
    # f32 accumulation inside the MXU, looser tolerance.
    wt16, b216 = prepare_gabor_params(weight, bias, compute_dtype=jnp.bfloat16)
    out16 = jax.block_until_ready(
        complex_gabor_forward(x, wt16, b216, out_features,
                              compute_dtype=jnp.bfloat16))
    assert out16.shape == ref.shape
    assert jnp.allclose(out16.astype(jnp.float32), ref, atol=5e-2, rtol=5e-2), \
        "bf16 mismatch vs reference"

    print("KERNEL_OK")
</pallas_src>

<mosaic_0001>
module attributes {stable_mosaic.version = 11 : i64} {
  func.func @_gabor_relu_fullk_kernel(%arg0: i32, %arg1: i32, %arg2: memref<16x32xf32, #tpu.memory_space<vmem>>, %arg3: memref<32x128xf32, #tpu.memory_space<vmem>>, %arg4: memref<1x128xf32, #tpu.memory_space<vmem>>, %arg5: memref<16x128xf32, #tpu.memory_space<vmem>>) attributes {dimension_semantics = [#tpu.dimension_semantics<parallel>, #tpu.dimension_semantics<parallel>], iteration_bounds = array<i64: 2, 1>, scalar_prefetch = 0 : i64, scratch_operands = 0 : i64, tpu.core_type = #tpu.core_type<tc>, window_params = [{transform_indices = @transform_0, window_bounds = array<i64: 16, 32>}, {transform_indices = @transform_1, window_bounds = array<i64: 32, 128>}, {transform_indices = @transform_2, window_bounds = array<i64: 1, 128>}, {transform_indices = @transform_3, window_bounds = array<i64: 16, 128>}]} {
    %c0 = arith.constant 0 : index
    %c0_0 = arith.constant 0 : index
    %0 = vector.load %arg2[%c0, %c0_0] : memref<16x32xf32, #tpu.memory_space<vmem>>, vector<16x32xf32>
    %c0_1 = arith.constant 0 : index
    %c0_2 = arith.constant 0 : index
    %1 = vector.load %arg3[%c0_1, %c0_2] : memref<32x128xf32, #tpu.memory_space<vmem>>, vector<32x128xf32>
    %cst = arith.constant dense<0.000000e+00> : vector<16x128xf32>
    %2 = tpu.matmul %0, %1, %cst {dimension_numbers = #tpu.dot_dimension_numbers<[1], [0], [0], [1], [0, 0, 1, 1], [], []>} : vector<16x32xf32>, vector<32x128xf32>, vector<16x128xf32> -> vector<16x128xf32>
    %c0_3 = arith.constant 0 : index
    %c0_4 = arith.constant 0 : index
    %3 = vector.load %arg4[%c0_3, %c0_4] : memref<1x128xf32, #tpu.memory_space<vmem>>, vector<1x128xf32>
    %4 = vector.broadcast %3 : vector<1x128xf32> to vector<16x128xf32>
    %5 = arith.addf %2, %4 : vector<16x128xf32>
    %cst_5 = arith.constant 0.000000e+00 : f32
    %6 = vector.broadcast %cst_5 : f32 to vector<16x128xf32>
    %7 = arith.maximumf %5, %6 : vector<16x128xf32>
    %c0_6 = arith.constant 0 : index
    %c0_7 = arith.constant 0 : index
    %8 = vector.load %arg5[%c0_6, %c0_7] : memref<16x128xf32, #tpu.memory_space<vmem>>, vector<16x128xf32>
    tpu.vector_store %arg5[%c0_6, %c0_7], %7 {strides = array<i32>} : memref<16x128xf32, #tpu.memory_space<vmem>>, vector<16x128xf32>,
    return
  }
  func.func @transform_0(%arg0: i32, %arg1: i32) -> (i32, i32) {
    %c0_i32 = arith.constant 0 : i32
    %c0_i32_0 = arith.constant 0 : i32
    return %arg0, %c0_i32 : i32, i32
  }
  func.func @transform_1(%arg0: i32, %arg1: i32) -> (i32, i32) {
    %c0_i32 = arith.constant 0 : i32
    %c0_i32_0 = arith.constant 0 : i32
    return %c0_i32, %arg1 : i32, i32
  }
  func.func @transform_2(%arg0: i32, %arg1: i32) -> (i32, i32) {
    %c0_i32 = arith.constant 0 : i32
    %c0_i32_0 = arith.constant 0 : i32
    return %c0_i32, %arg1 : i32, i32
  }
  func.func @transform_3(%arg0: i32, %arg1: i32) -> (i32, i32) {
    %c0_i32 = arith.constant 0 : i32
    return %arg0, %arg1 : i32, i32
  }
}

</mosaic_0001>

<bundles_post_ra>
// kernel: _lambda_.1
= control target key start
LH: loop header
LB: loop body
LE: loop exit
PB: predicated region body
PF: predicated region fallthrough
CT: control target
= control target key end

     0   :  { %8 = vsyncpa [#allocation3], 0  ;;  %s988_s0 = inlined_call_operand.hbm [shape: f32[32,32], index: 0, kind: input, shape index: {}]   ;;  %s989_s1 = inlined_call_operand.hbm [shape: f32[32,128], index: 1, kind: input, shape index: {}]   ;;  %s990_s2 = inlined_call_operand.vmem [shape: f32[1,128], index: 2, kind: input, shape index: {}]   ;;  %s991_s3 = inlined_call_operand.hbm [shape: f32[32,128], index: 3, kind: output, shape index: {}]  }
   0x1   :  { %10 = vsyncpa [#allocation3 + $0x1], 0 }
   0x2   :  { %11 = vsyncpa [#allocation6], 0 }
   0x3   :  { %12 = vsyncpa [#allocation4], 0 }
   0x4   :  { %14 = vsyncpa [#allocation4 + $0x1], 0  ;;  %s760_s12 = smov 0   ;;  %s762_s13 = smov 0  }
   0x5   :  { %s764_s14 = smov 0   ;;  %s766_s15 = smov 0  }
   0x6   :  { %s768_s16 = smov 0   ;;  %s770_s17 = smov 0  }
   0x7 LB: > { %s462_s18 = sadd.s32 4294967295, %s731_s17   ;;  %s463_s19 = sadd.s32 4294967294, %s731_s17   ;;  %s731_s17 = sphi %s770_s17, %s20_s17   ;;  %s727_s16 = sphi %s768_s16, %s1015_s16   ;;  %s723_s15 = sphi %s766_s15, %s1014_s15   ;;  %s719_s14 = sphi %s764_s14, %s1013_s14   ;;  %s715_s13 = sphi %s762_s13, %s1012_s13   ;;  %s711_s12 = sphi %s760_s12, %s1011_s12  }
   0x8   : > { %p52_p0 = scmp.ne.s32.totalorder %s715_s13, %s711_s12  ;;  %p794_p1 = scmp.eq.s32.totalorder %s462_s18, 0 }
   0x9   : > { %p798_p2 = scmp.eq.s32.totalorder %s462_s18, 1  ;;  %p136_p3 = scmp.eq.s32.totalorder %s463_s19, 1 }
   0xa   : > { %s996_s20 = scalar_select %p794_p1, 1, 0 }
   0xb   : > { %s997_s21 = scalar_select %p798_p2, 1, 0 }
   0xc   : > { %p804_p4 = por %p794_p1, %p52_p0  ;;  %p464_p5 = scmp.ge.s32.totalorder %s731_s17, 1 }
   0xd   : > { %p809_p6 = por %p136_p3, %p52_p0  ;;  %p143_p7 = scmp.lt.s32.totalorder %s731_s17, 3 }
   0xe   : > { %s998_s22 = scalar_select %p804_p4, 1, 0 }
   0xf   : > { %s999_s23 = scalar_select %p809_p6, 1, 0 }
  0x10   : > { %p814_p8 = pnand %p464_p5, %p143_p7  ;;  %s733_s25 = smov [#allocation5]  }
  0x11   : > { %s157_s26 = sshll.u32 %s733_s25, 4  ;;  %s32_s28 = sadd.s32 1, %s727_s16  ;;  %s158_s26 = int_to_ptr.vmem [resolvable:$true] %s157_s26 }
  0x12   : > { %s1000_s24 = scalar_select %p814_p8, 1, 0 }
  0x13   : > { %p518_p9 = pneg %p814_p8  ;;  %s587_s4 = scalar_lea.hbm %s989_s1, 512 }
  0x14   : > { %p588_p12 = scmp.ne.s32.totalorder %s989_s1, %s587_s4  ;;  %p594_p5 = scmp.lt.u32.totalorder %s587_s4, %s989_s1 }
  0x15   : > { %p823_p11 = pnand %p518_p9, %p794_p1 }
  0x17   : > { %p589_p13 = pneg %p823_p11 }
  0x19   : > { %p590_p0 = pnand %p589_p13, %p588_p12 }
  0x1b   : > { %p591_p3 = pneg %p590_p0 }
  0x1d   : > { %p596_p7 = pnand %p594_p5, %p591_p3 }
  0x1f   : > { %599 = shalt.err (!%p596_p7)
}
  0x20   : > { %s600_s9 = scalar_lea.vmem %s158_s26, 512  ;;  %p608_p1 = scmp.lt.s32.totalorder %s158_s26, %s158_s26 }
  0x21   : > { %p601_p9 = scmp.ne.s32.totalorder %s158_s26, %s600_s9  ;;  %p609_p4 = scmp.lt.s32.totalorder %s600_s9, %s600_s9 }
  0x23   : > { %p603_p10 = pnand %p601_p9, %p589_p13  ;;  %p610_p8 = por %p609_p4, %p608_p1 }
  0x25   : > { %p604_p6 = pneg %p603_p10 }
  0x27   : > { %p611_p2 = pnand %p610_p8, %p604_p6 }
  0x29   : > { %614 = shalt.err (!%p611_p2)
}
  0x2a   : > { %s734_s10 = smov 128   ;;  %s735_s11 = smov 8  }
  0x2b   : > { %521 = dma.hbm_to_vmem [thread:$0]  (!%p823_p11), %s989_s1, 512, %s158_s26, [#allocation6], %s734_s10, %s734_s10, %s735_s11  }
  0x2c   : > { %p34_p1 = scmp.ge.s32.totalorder %s32_s28, 2  ;;  %s39_s25 = sadd.s32 1, %s719_s14 }
  0x2d   : > { %p46_p2 = scmp.ne.s32.totalorder %s719_s14, %s715_s13  ;;  %p47_p4 = scmp.eq.s32.totalorder %s731_s17, 0 }
  0x2e   : > { %s1017_s28 = smov (%p34_p1, %s32_s28), 0  ;;  %p1003_p8 = scmp.ne.s32.totalorder %s997_s21, 0 }
  0x2f   : > { %p853_p6 = por %p47_p4, %p46_p2  ;;  %s36_s30 = ssub.s32 %s727_s16, %s1017_s28 }
  0x30   : > { %p859_p10 = por %p1003_p8, %p46_p2  ;;  %p531_p12 = scmp.lt.s32.totalorder %s731_s17, 2 }
  0x31   : > { %p37_p11 = scmp.eq.s32.totalorder %s36_s30, 0  ;;  %s177_s26 = sand.u32 1, %s719_s14  }
  0x32   : > { %s468_s4 = sshll.u32 %s177_s26, 4  ;;  %s483_s6 = sshll.u32 %s727_s16, 8 }
  0x33   : > { %s868_s5 = scalar_select %p37_p11, %s719_s14, %s39_s25  }
  0x34   : > { %s874_s9 = scalar_lea.hbm %s988_s0, %s483_s6  ;;  %s181_s21 = scalar_lea.vmem [#allocation2], %s468_s4 }
  0x35   : > { %s188_s18 = sshll.u32 %s181_s21, 4  ;;  %p880_p13 = pnand %p531_p12, %p853_p6  ;;  %s876_s18 = int_to_ptr.vmem [resolvable:$true] %s188_s18 }
  0x36   : > { %s884_s25 = scalar_lea.sflag [#allocation3], %s177_s26  ;;  %s615_s30 = scalar_lea.hbm %s874_s9, 256 }
  0x37   : > { %p616_p0 = scmp.ne.s32.totalorder %s874_s9, %s615_s30  ;;  %p617_p3 = pneg %p880_p13 }
  0x38   : > { %s620_s29 = scalar_lea.hbm %s988_s0, 512  ;;  %p621_p9 = scmp.lt.u32.totalorder %s874_s9, %s988_s0 }
  0x39   : > { %p618_p5 = pnand %p617_p3, %p616_p0  ;;  %p622_p1 = scmp.lt.u32.totalorder %s620_s29, %s615_s30 }
  0x3a   : > { %p624_p4 = scmp.lt.u32.totalorder %s615_s30, %s874_s9 }
  0x3b   : > { %p619_p7 = pneg %p618_p5  ;;  %p623_p2 = por %p622_p1, %p621_p9 }
  0x3d   : > { %p625_p6 = por %p624_p4, %p623_p2 }
  0x3f   : > { %p626_p8 = pnand %p625_p6, %p619_p7 }
  0x41   : > { %629 = shalt.err (!%p626_p8)
}
  0x42   : > { %s630_s26 = scalar_lea.vmem %s876_s18, 256  ;;  %s736_s21 = smov [#allocation2]  }
  0x43   : > { %p631_p12 = scmp.ne.s32.totalorder %s876_s18, %s630_s26  ;;  %s635_s4 = sshll.u32 %s736_s21, 4  ;;  %s636_s4 = int_to_ptr.vmem [resolvable:$false] %s635_s4 }
  0x44   : > { %s637_s6 = scalar_lea.vmem %s636_s4, 512  ;;  %p638_p5 = scmp.lt.s32.totalorder %s876_s18, %s636_s4 }
  0x45   : > { %p633_p11 = pnand %p631_p12, %p617_p3  ;;  %p639_p9 = scmp.lt.s32.totalorder %s637_s6, %s630_s26 }
  0x47   : > { %p634_p0 = pneg %p633_p11  ;;  %p640_p1 = por %p639_p9, %p638_p5 }
  0x49   : > { %p641_p2 = pnand %p640_p1, %p634_p0 }
  0x4b   : > { %644 = shalt.err (!%p641_p2)
}
  0x4c   : > { %525 = dma.hbm_to_vmem [thread:$0]  (!%p880_p13), %s874_s9, 256, %s876_s18, %s884_s25, %s734_s10, %s734_s10, %s735_s11  }
  0x4d   : > { %p1006_p3 = scmp.ne.s32.totalorder %s1000_s24, 0 }
  0x4e   : > { %s918_s30 = sand.u32 (!%p1006_p3), 1, %s715_s13   ;;  %p1007_p7 = scmp.ne.s32.totalorder (!%p1006_p3), %s998_s22, 0 }
  0x4f   : > { %200 = sbr.rel (%p1006_p3) target bundleno = 333 (0x14d), region = 32  ;;  %s472_s29 = sshll.u32 (!%p1006_p3), %s918_s30, 4 }
  0x50   : > { %s203_s7 = scalar_lea.sflag (!%p1006_p3), [#allocation3], %s918_s30  ;;  %s206_s8 = scalar_lea.vmem (!%p1006_p3), [#allocation2], %s472_s29 }
  0x56   : > { %698 = dma.done.wait (%p1007_p7), %s203_s7, 256  }
  0x57   : > { %700 = vsyncadd (%p1007_p7), %s203_s7, 4294967040  ;;  %p1008_p4 = scmp.ne.s32.totalorder %s996_s20, 0 }
  0x59   : > { %702 = dma.done.wait (%p1008_p4), [#allocation6], 512  }
  0x5a   : > { %704 = vsyncadd (%p1008_p4), [#allocation6], 4294966784  ;;  %vm254_vm0 = vcmask 261120   ;;  %v243_v0 = vld [vmem:[#allocation5] sm:$0xff]  ;;  %v244_v1 = vld [vmem:[#allocation5 + $0x8] sm:$0xff]  ;;  %s235_s24 = scalar_lea.vmem [#allocation7], %s472_s29 }
  0x5b   : > { %v245_v2 = vld [vmem:[#allocation5 + $0x10] sm:$0xff]  ;;  %v502_v3 = vpack.c.bf16 %v244_v1, %v243_v0  ;;  %v246_v4 = vld [vmem:[#allocation5 + $0x18] sm:$0xff]  ;;  %v475_v8 = vld [vmem:[%s990_s2] ss:$0 sm:$0xff]  ;;  %s355_s10 = sshll.u32 %s235_s24, 4  ;;  %s484_s11 = sshll.u32 %s723_s15, 8  ;;  %s934_s10 = int_to_ptr.vmem [resolvable:$true] %s355_s10 }
  0x5c   : > { %v241_v5 = vld [vmem:[%s206_s8] sm:$0xff]  ;;  %v506_v6 = vpack.c.bf16 %v246_v4, %v245_v2  ;;  %v242_v7 = vld [vmem:[%s206_s8 + $0x8] sm:$0xff]  ;;  %s939_s19 = scalar_lea.hbm %s991_s3, %s484_s11  ;;  %s341_s25 = scalar_lea.sflag [#allocation4], %s918_s30 }
  0x5d   : > { %499 = vmatprep.mubr.msk.f32.mxu0 %vm254_vm0, %v241_v5  ;;  %503 = vmatprep.subr.bf16.mxu0 %v502_v3  ;;  %s645_s26 = scalar_lea.vmem %s934_s10, 256  ;;  %s737_s15 = smov [#allocation7]  }
  0x5e   : > { %505 = vmatpush3.bf16.msra.mxu0 %v502_v3  ;;  %p646_p13 = scmp.ne.s32.totalorder %s934_s10, %s645_s26  ;;  %s649_s21 = sshll.u32 %s737_s15, 4  ;;  %s650_s21 = int_to_ptr.vmem [resolvable:$false] %s649_s21 }
  0x5f   : > { %507 = vmatprep.subr.bf16.mxu0 %v506_v6  ;;  %s651_s4 = scalar_lea.vmem %s650_s21, 512  ;;  %p652_p12 = scmp.lt.s32.totalorder %s934_s10, %s650_s21 }
  0x60   : > { %p647_p6 = pnand %p646_p13, %p859_p10  ;;  %p653_p11 = scmp.lt.s32.totalorder %s651_s4, %s645_s26 }
  0x62   : > { %509 = vmatpush3.bf16.msra.mxu0 %v506_v6  ;;  %p648_p8 = pneg %p647_p6  ;;  %p654_p0 = por %p653_p11, %p652_p12 }
  0x64   : > { %p655_p5 = pnand %p654_p0, %p648_p8 }
  0x65   : > { %500 = vmatmul.mubr.msk.f32.vlgmr.msra.gmra.mrb[0].mxu0 %vm254_vm0, %v242_v7 }
 0x138   : > { %v501_v9 = vpop.f32.mrb[0].mxu0 }
 0x139   : > { %v333_v10 = vadd.f32 %v501_v9, %v475_v8  ;;  %v327_v11 = vpop.f32.mrb[1].mxu0 }
 0x13a   : > { %v328_v12 = vadd.f32 %v475_v8, %v327_v11 }
 0x13b   : > { %v337_v13 = vmax.f32 %v333_v10, 0.0 }
 0x13c   : > { %v336_v14 = vmax.f32 %v328_v12, 0.0 }
 0x13d   : > { %339 = vst [vmem:[%s235_s24 + $0x8] sm:$0xff] %v337_v13 }
 0x13e   : > { %338 = vst [vmem:[%s235_s24] sm:$0xff] %v336_v14 }
 0x13f   : > { %658 = shalt.err (!%p655_p5)
}
 0x140   : > { %s659_s6 = scalar_lea.hbm %s939_s19, 256  ;;  %s663_s8 = scalar_lea.hbm %s991_s3, 512 }
 0x141   : > { %p660_p9 = scmp.ne.s32.totalorder %s939_s19, %s659_s6  ;;  %p664_p3 = scmp.lt.u32.totalorder %s939_s19, %s991_s3 }
 0x142   : > { %p665_p7 = scmp.lt.u32.totalorder %s663_s8, %s659_s6  ;;  %p667_p13 = scmp.lt.u32.totalorder %s659_s6, %s939_s19 }
 0x143   : > { %p661_p1 = pnand %p660_p9, %p859_p10 }
 0x144   : > { %p666_p4 = por %p665_p7, %p664_p3 }
 0x145   : > { %p662_p2 = pneg %p661_p1 }
 0x146   : > { %p668_p6 = por %p667_p13, %p666_p4 }
 0x148   : > { %p669_p8 = pnand %p668_p6, %p662_p2 }
 0x14a   : > { %672 = shalt.err (!%p669_p8)
}
 0x14b   : > { %s738_s24 = smov 128   ;;  %s739_s11 = smov 8  }
 0x14c   : > { %516 = dma.vmem_to_hbm [thread:$0]  (%p859_p10), %s934_s10, 256, %s939_s19, %s341_s25, %s738_s24, %s738_s24, %s739_s11  }
 0x14d PF: > { %s370_s9 = sand.u32 1, %s711_s12   ;;  %p1009_p12 = scmp.ne.s32.totalorder %s999_s23, 0 }
 0x14e   : > { %p1010_p11 = scmp.ge.s32.totalorder %s731_s17, 2  ;;  %s371_s18 = scalar_lea.sflag [#allocation4], %s370_s9 }
 0x150   : > { %p527_p0 = pnand %p1010_p11, %p1009_p12 }
 0x152   : > { %706 = dma.done.wait (!%p527_p0), %s371_s18, 256  }
 0x153   : > { %708 = vsyncadd (!%p527_p0), %s371_s18, 4294967040  ;;  %s20_s17 = sadd.s32 1, %s731_s17   ;;  %s1011_s12 = smov %s715_s13 }
 0x154   : > { %p17_p5 = scmp.ge.s32.totalorder %s20_s17, 4   ;;  %s1012_s13 = smov %s719_s14 }
 0x155   : > { %s1013_s14 = smov %s868_s5  ;;  %s1014_s15 = smov %s727_s16 }
 0x156   : > { %s1015_s16 = smov %s1017_s28  ;;  %19 = sbr.rel (!%p17_p5) target bundleno = 7 (0x7), region = 85 }
 0x15d   :  { %376 = vsyncpa [#allocation3], 1 }
 0x15e   :  { %378 = vsyncpa [#allocation3 + $0x1], 1 }
 0x15f   :  { %379 = vsyncpa [#allocation6], 1 }
 0x160   :  { %380 = vsyncpa [#allocation4], 1 }
 0x161   :  { %382 = vsyncpa [#allocation4 + $0x1], 1 }

</bundles_post_ra>
